<compile_context>
chip_gen: v6e
topology: v6e:2x2x1
jax: 0.10.0
libtpu: 0.0.40
codegen_flags: <defaults>
</compile_context>

<pallas_src>
import functools

import jax
import jax.numpy as jnp
from jax import lax
from jax.experimental import pallas as pl
from jax.experimental.pallas import tpu as pltpu

LANE = 128


def _spectral_kernel(emb_ref, wc_ref, b_ref, x_ref, w_ref, o_ref, *, chunk, unroll):
    """One (corner, mode-tile) program: FreqLinear + channel mix + cond. modulation.

    Ref shapes (TM = mode-tile lane width, a multiple of `chunk`):
      emb_ref (B, Cc)            f32
      wc_ref  (Cc, 2*TM)         f32   chunk-interleaved planes [re | im]
      b_ref   (1,  2*TM)         f32
      x_ref   (Cin, 2*B, TM)     f32   rows = [Re x(b=0..B-1) ; Im x(b=0..B-1)]
      w_ref   (Cin, 2*Cout, TM)  bf16  rows = [Re w(o=0..C-1) ; Im w(o=0..C-1)]
      o_ref   (2, B*Cout, TM)    f32   planes = [Re out ; Im out], row = b*Cout + o
    """
    f32 = jnp.float32
    emb = emb_ref[...]                        # (B, Cc)
    B = emb.shape[0]
    Cin = x_ref.shape[0]
    Cout = w_ref.shape[1] // 2
    TM = x_ref.shape[-1]
    BC = B * Cout
    n_chunks = TM // chunk

    @pl.loop(0, n_chunks)
    def _(c):
        off = pl.multiple_of(c * chunk, chunk)
        off2 = pl.multiple_of(c * (2 * chunk), 2 * chunk)

        # FreqLinear for this lane chunk: one fused MXU dot producing both the real
        # and imaginary embedding planes lane-concatenated, then static slices.
        e = jnp.dot(emb, wc_ref[:, pl.ds(off2, 2 * chunk)],
                    preferred_element_type=f32) + b_ref[:, pl.ds(off2, 2 * chunk)]
        er = e[:, :chunk]                      # (B, chunk)
        ei = e[:, chunk:]
        # Broadcast once to the flattened (B*Cout, chunk) accumulator rows.
        er_bc = jnp.broadcast_to(er[:, None, :], (B, Cout, chunk)).reshape(BC, chunk)
        ei_bc = jnp.broadcast_to(ei[:, None, :], (B, Cout, chunk)).reshape(BC, chunk)

        # Channel-mixing reduction over Cin on the VPU with full-sublane operands.
        # NOTE: for large Cin/Cout/B this contraction should move onto the MXU; at
        # this module's small channel counts the VPU formulation is the right regime.
        def body(i, carry):
            ar, ai = carry
            xs = x_ref[i, :, pl.ds(off, chunk)]                 # (2B, chunk) f32
            ws = w_ref[i, :, pl.ds(off, chunk)].astype(f32)     # (2Cout, chunk)
            xr, xi = xs[:B], xs[B:]
            wr, wi = ws[:Cout], ws[Cout:]
            # Hoisted broadcasts (JAX does not CSE broadcast_in_dim): reused twice each.
            xr_bc = jnp.broadcast_to(xr[:, None, :], (B, Cout, chunk)).reshape(BC, chunk)
            xi_bc = jnp.broadcast_to(xi[:, None, :], (B, Cout, chunk)).reshape(BC, chunk)
            wr_t = jnp.broadcast_to(wr[None], (B, Cout, chunk)).reshape(BC, chunk)
            wi_t = jnp.broadcast_to(wi[None], (B, Cout, chunk)).reshape(BC, chunk)
            ar = ar + xr_bc * wr_t - xi_bc * wi_t
            ai = ai + xr_bc * wi_t + xi_bc * wr_t
            return ar, ai

        zero = jnp.zeros((BC, chunk), f32)
        ar, ai = lax.fori_loop(0, Cin, body, (zero, zero), unroll=unroll)

        # out = emb * (sum_i x_i w_i)  (complex). Full-sublane, unmasked lane stores.
        o_ref[0, :, pl.ds(off, chunk)] = ar * er_bc - ai * ei_bc
        o_ref[1, :, pl.ds(off, chunk)] = ar * ei_bc + ai * er_bc


def init_params(key, in_channels, out_channels, cond_channels, n_modes):
    m1, m2 = n_modes
    k = jax.random.split(key, 4)
    # NOTE: the PyTorch module initialises FreqLinear weights/bias to zero
    # (degenerate); deterministic randoms here so the kernel path is exercised.
    wc = jax.random.normal(k[0], (cond_channels, 4 * m1 * m2), jnp.float32)
    wc = wc / jnp.sqrt(jnp.float32(cond_channels))
    bc = 0.1 * jax.random.normal(k[1], (1, 4 * m1 * m2), jnp.float32)
    # weight_{1,2}: complex (Cin, Cout, m1, m2); kaiming-like real part, zero imag
    # (reset_parameters only touches .real).
    fan_in = out_channels * m1 * m2
    std = (2.0 / fan_in) ** 0.5
    w1r = std * jax.random.normal(k[2], (in_channels, out_channels, m1, m2), jnp.float32)
    w2r = std * jax.random.normal(k[3], (in_channels, out_channels, m1, m2), jnp.float32)
    return dict(wc=wc, bc=bc,
                w1r=w1r, w1i=jnp.zeros_like(w1r),
                w2r=w2r, w2i=jnp.zeros_like(w2r))


def _pad_lane(a, target):
    pad = target - a.shape[-1]
    if pad == 0:
        return a
    return jnp.pad(a, [(0, 0)] * (a.ndim - 1) + [(0, pad)])


def pack_params(params, n_modes, weight_dtype=jnp.bfloat16):
    """One-time repack of FNOConv2d parameters into the lane-dense kernel layout."""
    m1, m2 = n_modes
    M = m1 * m2
    Mpad = -(-M // LANE) * LANE
    wc, bc = params["wc"], params["bc"]
    Cc = wc.shape[0]
    # FreqLinear flat column = 4*mode + 2*corner + reim (matches
    # reshape(B, m1, m2, 2, 2) + view_as_complex in the PyTorch module).
    wc_planes = jnp.stack([wc[:, 0::4], wc[:, 1::4], wc[:, 2::4], wc[:, 3::4]], axis=0)
    b_planes = jnp.stack([bc[:, 0::4], bc[:, 1::4], bc[:, 2::4], bc[:, 3::4]], axis=0)
    wc_planes = _pad_lane(wc_planes, Mpad).reshape(2, 2, Cc, Mpad)   # [corner, reim, Cc, M]
    b_planes = _pad_lane(b_planes, Mpad).reshape(2, 2, 1, Mpad)

    Cin, Cout = params["w1r"].shape[:2]

    def corner_w(wr, wi):   # -> (Cin, 2*Cout, M), rows [Re(o=0..), Im(o=0..)]
        return jnp.stack([wr.reshape(Cin, Cout, M), wi.reshape(Cin, Cout, M)],
                         axis=1).reshape(Cin, 2 * Cout, M)

    w_pack = jnp.stack([corner_w(params["w1r"], params["w1i"]),
                        corner_w(params["w2r"], params["w2i"])], axis=0)  # (2,Cin,2Cout,M)
    return dict(
        wc=wc_planes.astype(jnp.float32),                    # (2, 2, Cc, Mpad)
        b=b_planes.astype(jnp.float32),                      # (2, 2, 1, Mpad)
        w=_pad_lane(w_pack, Mpad).astype(weight_dtype),      # (2, Cin, 2*Cout, Mpad)
        n_modes=n_modes, M=M, Mpad=Mpad, Cin=Cin, Cout=Cout, Cc=Cc)


def _vmem_capacity_bytes():
    """Per-generation VMEM: 128 MiB on v5e/v6e, 64 MiB per TensorCore on v7x."""
    try:
        cap = int(pltpu.get_tpu_info().vmem_capacity_bytes)
        if cap > 0:
            return cap
    except Exception:
        pass
    return 64 * 1024 * 1024          # conservative fallback (v7x-sized)


def _per_mode_bytes(B, Cin, Cout, Cc, w_itemsize):
    """VMEM block bytes per mode column, per (corner, tile) grid step."""
    return (2 * Cin * Cout * w_itemsize      # spectral weights (dominant stream)
            + 2 * B * Cin * 4                # packed spectra
            + 2 * B * Cout * 4               # packed outputs
            + 2 * Cc * 4 + 2 * 4)            # fused FreqLinear columns + bias


def _choose_tile_m(Mpad, per_mode, step_budget_bytes, max_tile_m=2048):
    """Largest lane tile (multiple of 128 dividing Mpad) under the step budget."""
    tm = (step_budget_bytes // max(per_mode, 1)) // LANE * LANE
    tm = max(LANE, min(tm, max_tile_m, Mpad))
    while Mpad % tm:
        tm -= LANE
    return int(tm)


def fno_conv2d_forward(x, emb, packed, tile_m=None):
    B, Cin, H, W = x.shape
    m1, m2 = packed["n_modes"]
    M, Mpad = packed["M"], packed["Mpad"]
    Cout, Cc = packed["Cout"], packed["Cc"]
    assert Cin == packed["Cin"] and emb.shape == (B, Cc)
    Wf = W // 2 + 1
    assert min(H // 2, m1) == m1 and min(Wf, m2) == m2, \
        "mode counts must fit the spatial grid"

    # TODO(synk): torch.fft.rfft2 / irfft2 have no Pallas primitive; kept in JAX.
    x_ft = jnp.fft.rfft2(x, norm="ortho")                       # (B, Cin, H, Wf) c64

    x1 = x_ft[:, :, :m1, :m2].reshape(B, Cin, M)
    x2 = x_ft[:, :, H - m1:, :m2].reshape(B, Cin, M)

    def corner_x(xc):   # (B, Cin, M) c64 -> (Cin, 2B, M) f32, rows [Re(b..), Im(b..)]
        xp = jnp.stack([jnp.real(xc), jnp.imag(xc)], axis=0)    # (2, B, Cin, M)
        return jnp.transpose(xp, (2, 0, 1, 3)).reshape(Cin, 2 * B, M)

    x_pack = _pad_lane(
        jnp.stack([corner_x(x1), corner_x(x2)], axis=0).astype(jnp.float32),
        Mpad)                                                   # (2, Cin, 2B, Mpad)

    w_pack = packed["w"]
    w_itemsize = w_pack.dtype.itemsize

    # Per-generation tile sizing: largest DMA lane tile under the step budget
    # (16 MiB on 128 MiB-VMEM chips, 8 MiB on v7x), double-buffered by BlockSpec.
    vmem_cap = _vmem_capacity_bytes()
    per_mode = _per_mode_bytes(B, Cin, Cout, Cc, w_itemsize)
    step_budget = min(16 * 1024 * 1024, vmem_cap // 8)
    tm = _choose_tile_m(Mpad, per_mode, step_budget) if tile_m is None else int(tile_m)
    assert tm % LANE == 0 and Mpad % tm == 0

    # In-register lane width is bounded by an in-kernel chunk loop, independently
    # of the (possibly much larger) DMA tile tm -> no accumulator spills.
    chunk = 256 if tm % 256 == 0 else LANE
    unroll = Cin if Cin <= 4 else 4

    # Interleave the FreqLinear {re, im} planes at chunk granularity so the kernel
    # issues a single fused MXU dot per chunk (quarters MXU push/pop count).
    n_ch = Mpad // chunk
    wc_f = (packed["wc"].reshape(2, 2, Cc, n_ch, chunk)
            .transpose(0, 2, 3, 1, 4).reshape(2, Cc, 2 * Mpad))
    b_f = (packed["b"].reshape(2, 2, 1, n_ch, chunk)
           .transpose(0, 2, 3, 1, 4).reshape(2, 1, 2 * Mpad))

    # (corner, mode tile): always >= 2 independent "parallel" programs, so v7x's
    # two TensorCores both get work even when Mpad//tm == 1.
    grid = (2, Mpad // tm)

    # Leave >=16 MiB of VMEM headroom for compiler scratch (matters on v7x's 64 MiB).
    vmem_limit = int(min(vmem_cap - 16 * 1024 * 1024,
                         max(32 * 1024 * 1024, 4 * per_mode * tm)))

    flops = (16 * B * Cin * Cout * Mpad       # complex channel mix
             + 8 * B * Cc * Mpad              # FreqLinear
             + 12 * B * Cout * Mpad)          # conditional modulation
    bytes_accessed = (B * Cc * 4 + 2 * Cc * 2 * Mpad * 4 + 2 * 2 * Mpad * 4
                      + 2 * Cin * 2 * B * Mpad * 4
                      + 2 * Cin * 2 * Cout * Mpad * w_itemsize
                      + 2 * 2 * B * Cout * Mpad * 4)

    kernel = functools.partial(_spectral_kernel, chunk=chunk, unroll=unroll)
    o_pack = pl.pallas_call(
        kernel,
        grid=grid,
        in_specs=[
            pl.BlockSpec((B, Cc), lambda c, t: (0, 0)),
            pl.BlockSpec((None, Cc, 2 * tm), lambda c, t: (c, 0, t)),
            pl.BlockSpec((None, 1, 2 * tm), lambda c, t: (c, 0, t)),
            pl.BlockSpec((None, Cin, 2 * B, tm), lambda c, t: (c, 0, 0, t)),
            pl.BlockSpec((None, Cin, 2 * Cout, tm), lambda c, t: (c, 0, 0, t)),
        ],
        out_specs=pl.BlockSpec((None, 2, B * Cout, tm), lambda c, t: (c, 0, 0, t)),
        out_shape=jax.ShapeDtypeStruct((2, 2, B * Cout, Mpad), jnp.float32),
        compiler_params=pltpu.CompilerParams(
            dimension_semantics=("parallel", "parallel"),
            vmem_limit_bytes=vmem_limit),
        cost_estimate=pl.CostEstimate(flops=flops, transcendentals=0,
                                      bytes_accessed=bytes_accessed),
    )(emb.astype(jnp.float32), wc_f, b_f, x_pack, w_pack)

    # Drop the zero lane-padding before scattering back into the spectrum.
    o = o_pack[..., :M]
    out1 = (o[0, 0] + 1j * o[0, 1]).reshape(B, Cout, m1, m2)
    out2 = (o[1, 0] + 1j * o[1, 1]).reshape(B, Cout, m1, m2)
    out_ft = jnp.zeros((B, Cout, H, Wf), jnp.complex64)
    out_ft = out_ft.at[:, :, :m1, :m2].set(out1)
    out_ft = out_ft.at[:, :, H - m1:, :m2].set(out2)
    return jnp.fft.irfft2(out_ft, s=(H, W), norm="ortho")


def fno_conv2d_reference(x, emb, params, n_modes, out_channels,
                         weight_dtype=jnp.float32):
    """Pure-JAX reference mirroring the PyTorch forward (weight_dtype mirrors the
    kernel's spectral-weight storage precision; math stays f32)."""
    m1, m2 = n_modes
    B = x.shape[0]
    H, W = x.shape[-2], x.shape[-1]
    h = emb @ params["wc"] + params["bc"]
    h = h.reshape(B, m1, m2, 2, 2)
    ce = h[..., 0] + 1j * h[..., 1]                       # view_as_complex
    e1, e2 = ce[..., 0], ce[..., 1]
    cast = lambda a: a.astype(weight_dtype).astype(jnp.float32)
    w1 = cast(params["w1r"]) + 1j * cast(params["w1i"])
    w2 = cast(params["w2r"]) + 1j * cast(params["w2i"])
    x_ft = jnp.fft.rfft2(x, norm="ortho")
    Wf = W // 2 + 1
    out_ft = jnp.zeros((B, out_channels, H, Wf), jnp.complex64)
    out_ft = out_ft.at[:, :, :m1, :m2].set(
        jnp.einsum("bixy,ioxy->boxy", x_ft[:, :, :m1, :m2] * e1[:, None], w1))
    out_ft = out_ft.at[:, :, H - m1:, :m2].set(
        jnp.einsum("bixy,ioxy->boxy", x_ft[:, :, H - m1:, :m2] * e2[:, None], w2))
    return jnp.fft.irfft2(out_ft, s=(H, W), norm="ortho")


if __name__ == "__main__":
    B, Cin, Cout, Cc = 2, 4, 4, 8
    H = W = 16
    n_modes = (4, 5)
    wdt = jnp.bfloat16                       # spectral-weight storage dtype

    key = jax.random.PRNGKey(0)
    kx, ke, kp = jax.random.split(key, 3)
    x = jax.random.normal(kx, (B, Cin, H, W), jnp.float32)
    emb = jax.random.normal(ke, (B, Cc), jnp.float32)
    params = init_params(kp, Cin, Cout, Cc, n_modes)
    packed = pack_params(params, n_modes, weight_dtype=wdt)

    y = jax.block_until_ready(fno_conv2d_forward(x, emb, packed))
    y_ref = fno_conv2d_reference(x, emb, params, n_modes, Cout, weight_dtype=wdt)
    assert y.shape == (B, Cout, H, W) and y.dtype == jnp.float32
    assert jnp.allclose(y, y_ref, rtol=1e-3, atol=1e-3), "mismatch vs reference (1)"

    # Larger-mode config: auto tile (tm=384 -> 3 lane chunks per program) and an
    # explicit small tile (tm=128 -> grid=(2,3)) to exercise the pipelined grid.
    H2 = W2 = 64
    n_modes2 = (16, 20)
    kx2, kp2 = jax.random.split(jax.random.PRNGKey(1))
    x2 = jax.random.normal(kx2, (B, Cin, H2, W2), jnp.float32)
    params2 = init_params(kp2, Cin, Cout, Cc, n_modes2)
    packed2 = pack_params(params2, n_modes2, weight_dtype=wdt)
    y2_ref = fno_conv2d_reference(x2, emb, params2, n_modes2, Cout, weight_dtype=wdt)
    y2a = jax.block_until_ready(fno_conv2d_forward(x2, emb, packed2))
    y2b = jax.block_until_ready(fno_conv2d_forward(x2, emb, packed2, tile_m=128))
    assert jnp.allclose(y2a, y2_ref, rtol=1e-3, atol=1e-3), "mismatch vs reference (2)"
    assert jnp.allclose(y2b, y2_ref, rtol=1e-3, atol=1e-3), "mismatch vs reference (3)"

    print("KERNEL_OK")
</pallas_src>

<mosaic_0001>
module attributes {stable_mosaic.version = 11 : i64} {
  func.func @_spectral_kernel(%arg0: i32, %arg1: i32, %arg2: memref<2x8xf32, #tpu.memory_space<vmem>>, %arg3: memref<1x8x256xf32, #tpu.memory_space<vmem>>, %arg4: memref<1x1x256xf32, #tpu.memory_space<vmem>>, %arg5: memref<1x4x4x128xf32, #tpu.memory_space<vmem>>, %arg6: memref<1x4x8x128xbf16, #tpu.memory_space<vmem>>, %arg7: memref<1x2x8x128xf32, #tpu.memory_space<vmem>>) attributes {dimension_semantics = [#tpu.dimension_semantics<parallel>, #tpu.dimension_semantics<parallel>], iteration_bounds = array<i64: 2, 1>, scalar_prefetch = 0 : i64, scratch_operands = 0 : i64, tpu.core_type = #tpu.core_type<tc>, window_params = [{pipeline_mode = #tpu.pipeline_mode<synchronous>, transform_indices = @transform_0, window_bounds = array<i64: 2, 8>}, {transform_indices = @transform_1, window_bounds = array<i64: 1, 8, 256>}, {transform_indices = @transform_2, window_bounds = array<i64: 1, 1, 256>}, {transform_indices = @transform_3, window_bounds = array<i64: 1, 4, 4, 128>}, {transform_indices = @transform_4, window_bounds = array<i64: 1, 4, 8, 128>}, {transform_indices = @transform_5, window_bounds = array<i64: 1, 2, 8, 128>}]} {
    %c0 = arith.constant 0 : index
    %c0_0 = arith.constant 0 : index
    %0 = vector.load %arg2[%c0, %c0_0] : memref<2x8xf32, #tpu.memory_space<vmem>>, vector<2x8xf32>
    %c0_i32 = arith.constant 0 : i32
    %c1_i32 = arith.constant 1 : i32
    %1 = arith.muli %c0_i32, %c1_i32 : i32
    %c0_i32_1 = arith.constant 0 : i32
    %2 = arith.addi %c0_i32_1, %1 : i32
    %c128_i32 = arith.constant 128 : i32
    %3 = arith.muli %2, %c128_i32 : i32
    %4 = tpu.assume_multiple %3, 128 : i32
    %c256_i32 = arith.constant 256 : i32
    %5 = arith.muli %2, %c256_i32 : i32
    %6 = tpu.assume_multiple %5, 256 : i32
    %c0_2 = arith.constant 0 : index
    %c0_3 = arith.constant 0 : index
    %7 = arith.index_cast %6 : i32 to index
    %8 = vector.load %arg3[%c0_2, %c0_3, %7] : memref<1x8x256xf32, #tpu.memory_space<vmem>>, vector<1x8x256xf32>
    %9 = vector.shape_cast %8 : vector<1x8x256xf32> to vector<8x256xf32>
    %cst = arith.constant dense<0.000000e+00> : vector<2x256xf32>
    %10 = tpu.matmul %0, %9, %cst {dimension_numbers = #tpu.dot_dimension_numbers<[1], [0], [0], [1], [0, 0, 1, 1], [], []>} : vector<2x8xf32>, vector<8x256xf32>, vector<2x256xf32> -> vector<2x256xf32>
    %c0_4 = arith.constant 0 : index
    %c0_5 = arith.constant 0 : index
    %11 = arith.index_cast %6 : i32 to index
    %12 = vector.load %arg4[%c0_4, %c0_5, %11] : memref<1x1x256xf32, #tpu.memory_space<vmem>>, vector<1x1x256xf32>
    %13 = vector.shape_cast %12 : vector<1x1x256xf32> to vector<1x256xf32>
    %14 = vector.broadcast %13 : vector<1x256xf32> to vector<2x256xf32>
    %15 = arith.addf %10, %14 : vector<2x256xf32>
    %16 = vector.extract_strided_slice %15 {offsets = [0, 0], sizes = [2, 128], strides = [1, 1]} : vector<2x256xf32> to vector<2x128xf32>
    %17 = vector.extract_strided_slice %15 {offsets = [0, 128], sizes = [2, 128], strides = [1, 1]} : vector<2x256xf32> to vector<2x128xf32>
    %18 = vector.shape_cast %16 : vector<2x128xf32> to vector<2x1x128xf32>
    %19 = vector.shape_cast %18 : vector<2x1x128xf32> to vector<2x1x128xf32>
    %20 = vector.broadcast %19 : vector<2x1x128xf32> to vector<2x4x128xf32>
    %21 = vector.shape_cast %20 : vector<2x4x128xf32> to vector<8x128xf32>
    %22 = vector.shape_cast %17 : vector<2x128xf32> to vector<2x1x128xf32>
    %23 = vector.shape_cast %22 : vector<2x1x128xf32> to vector<2x1x128xf32>
    %24 = vector.broadcast %23 : vector<2x1x128xf32> to vector<2x4x128xf32>
    %25 = vector.shape_cast %24 : vector<2x4x128xf32> to vector<8x128xf32>
    %cst_6 = arith.constant 0.000000e+00 : f32
    %26 = vector.broadcast %cst_6 : f32 to vector<8x128xf32>
    %c0_i32_7 = arith.constant 0 : i32
    %c0_8 = arith.constant 0 : index
    %27 = arith.index_cast %c0_i32_7 : i32 to index
    %c0_9 = arith.constant 0 : index
    %28 = arith.index_cast %4 : i32 to index
    %29 = vector.load %arg5[%c0_8, %27, %c0_9, %28] : memref<1x4x4x128xf32, #tpu.memory_space<vmem>>, vector<1x1x4x128xf32>
    %30 = vector.shape_cast %29 : vector<1x1x4x128xf32> to vector<4x128xf32>
    %c0_10 = arith.constant 0 : index
    %31 = arith.index_cast %c0_i32_7 : i32 to index
    %c0_11 = arith.constant 0 : index
    %32 = arith.index_cast %4 : i32 to index
    %33 = vector.load %arg6[%c0_10, %31, %c0_11, %32] : memref<1x4x8x128xbf16, #tpu.memory_space<vmem>>, vector<1x1x8x128xbf16>
    %34 = vector.shape_cast %33 : vector<1x1x8x128xbf16> to vector<8x128xbf16>
    %35 = arith.extf %34 : vector<8x128xbf16> to vector<8x128xf32>
    %36 = vector.extract_strided_slice %30 {offsets = [0, 0], sizes = [2, 128], strides = [1, 1]} : vector<4x128xf32> to vector<2x128xf32>
    %37 = vector.extract_strided_slice %30 {offsets = [2, 0], sizes = [2, 128], strides = [1, 1]} : vector<4x128xf32> to vector<2x128xf32>
    %38 = vector.extract_strided_slice %35 {offsets = [0, 0], sizes = [4, 128], strides = [1, 1]} : vector<8x128xf32> to vector<4x128xf32>
    %39 = vector.extract_strided_slice %35 {offsets = [4, 0], sizes = [4, 128], strides = [1, 1]} : vector<8x128xf32> to vector<4x128xf32>
    %40 = vector.shape_cast %36 : vector<2x128xf32> to vector<2x1x128xf32>
    %41 = vector.shape_cast %40 : vector<2x1x128xf32> to vector<2x1x128xf32>
    %42 = vector.broadcast %41 : vector<2x1x128xf32> to vector<2x4x128xf32>
    %43 = vector.shape_cast %42 : vector<2x4x128xf32> to vector<8x128xf32>
    %44 = vector.shape_cast %37 : vector<2x128xf32> to vector<2x1x128xf32>
    %45 = vector.shape_cast %44 : vector<2x1x128xf32> to vector<2x1x128xf32>
    %46 = vector.broadcast %45 : vector<2x1x128xf32> to vector<2x4x128xf32>
    %47 = vector.shape_cast %46 : vector<2x4x128xf32> to vector<8x128xf32>
    %48 = vector.shape_cast %38 : vector<4x128xf32> to vector<1x4x128xf32>
    %49 = vector.shape_cast %48 : vector<1x4x128xf32> to vector<1x4x128xf32>
    %50 = vector.broadcast %49 : vector<1x4x128xf32> to vector<2x4x128xf32>
    %51 = vector.shape_cast %50 : vector<2x4x128xf32> to vector<8x128xf32>
    %52 = vector.shape_cast %39 : vector<4x128xf32> to vector<1x4x128xf32>
    %53 = vector.shape_cast %52 : vector<1x4x128xf32> to vector<1x4x128xf32>
    %54 = vector.broadcast %53 : vector<1x4x128xf32> to vector<2x4x128xf32>
    %55 = vector.shape_cast %54 : vector<2x4x128xf32> to vector<8x128xf32>
    %56 = arith.mulf %43, %51 : vector<8x128xf32>
    %57 = arith.addf %26, %56 : vector<8x128xf32>
    %58 = arith.mulf %47, %55 : vector<8x128xf32>
    %59 = arith.subf %57, %58 : vector<8x128xf32>
    %60 = arith.mulf %43, %55 : vector<8x128xf32>
    %61 = arith.addf %26, %60 : vector<8x128xf32>
    %62 = arith.mulf %47, %51 : vector<8x128xf32>
    %63 = arith.addf %61, %62 : vector<8x128xf32>
    %c1_i32_12 = arith.constant 1 : i32
    %c0_13 = arith.constant 0 : index
    %64 = arith.index_cast %c1_i32_12 : i32 to index
    %c0_14 = arith.constant 0 : index
    %65 = arith.index_cast %4 : i32 to index
    %66 = vector.load %arg5[%c0_13, %64, %c0_14, %65] : memref<1x4x4x128xf32, #tpu.memory_space<vmem>>, vector<1x1x4x128xf32>
    %67 = vector.shape_cast %66 : vector<1x1x4x128xf32> to vector<4x128xf32>
    %c0_15 = arith.constant 0 : index
    %68 = arith.index_cast %c1_i32_12 : i32 to index
    %c0_16 = arith.constant 0 : index
    %69 = arith.index_cast %4 : i32 to index
    %70 = vector.load %arg6[%c0_15, %68, %c0_16, %69] : memref<1x4x8x128xbf16, #tpu.memory_space<vmem>>, vector<1x1x8x128xbf16>
    %71 = vector.shape_cast %70 : vector<1x1x8x128xbf16> to vector<8x128xbf16>
    %72 = arith.extf %71 : vector<8x128xbf16> to vector<8x128xf32>
    %73 = vector.extract_strided_slice %67 {offsets = [0, 0], sizes = [2, 128], strides = [1, 1]} : vector<4x128xf32> to vector<2x128xf32>
    %74 = vector.extract_strided_slice %67 {offsets = [2, 0], sizes = [2, 128], strides = [1, 1]} : vector<4x128xf32> to vector<2x128xf32>
    %75 = vector.extract_strided_slice %72 {offsets = [0, 0], sizes = [4, 128], strides = [1, 1]} : vector<8x128xf32> to vector<4x128xf32>
    %76 = vector.extract_strided_slice %72 {offsets = [4, 0], sizes = [4, 128], strides = [1, 1]} : vector<8x128xf32> to vector<4x128xf32>
    %77 = vector.shape_cast %73 : vector<2x128xf32> to vector<2x1x128xf32>
    %78 = vector.shape_cast %77 : vector<2x1x128xf32> to vector<2x1x128xf32>
    %79 = vector.broadcast %78 : vector<2x1x128xf32> to vector<2x4x128xf32>
    %80 = vector.shape_cast %79 : vector<2x4x128xf32> to vector<8x128xf32>
    %81 = vector.shape_cast %74 : vector<2x128xf32> to vector<2x1x128xf32>
    %82 = vector.shape_cast %81 : vector<2x1x128xf32> to vector<2x1x128xf32>
    %83 = vector.broadcast %82 : vector<2x1x128xf32> to vector<2x4x128xf32>
    %84 = vector.shape_cast %83 : vector<2x4x128xf32> to vector<8x128xf32>
    %85 = vector.shape_cast %75 : vector<4x128xf32> to vector<1x4x128xf32>
    %86 = vector.shape_cast %85 : vector<1x4x128xf32> to vector<1x4x128xf32>
    %87 = vector.broadcast %86 : vector<1x4x128xf32> to vector<2x4x128xf32>
    %88 = vector.shape_cast %87 : vector<2x4x128xf32> to vector<8x128xf32>
    %89 = vector.shape_cast %76 : vector<4x128xf32> to vector<1x4x128xf32>
    %90 = vector.shape_cast %89 : vector<1x4x128xf32> to vector<1x4x128xf32>
    %91 = vector.broadcast %90 : vector<1x4x128xf32> to vector<2x4x128xf32>
    %92 = vector.shape_cast %91 : vector<2x4x128xf32> to vector<8x128xf32>
    %93 = arith.mulf %80, %88 : vector<8x128xf32>
    %94 = arith.addf %59, %93 : vector<8x128xf32>
    %95 = arith.mulf %84, %92 : vector<8x128xf32>
    %96 = arith.subf %94, %95 : vector<8x128xf32>
    %97 = arith.mulf %80, %92 : vector<8x128xf32>
    %98 = arith.addf %63, %97 : vector<8x128xf32>
    %99 = arith.mulf %84, %88 : vector<8x128xf32>
    %100 = arith.addf %98, %99 : vector<8x128xf32>
    %c2_i32 = arith.constant 2 : i32
    %c0_17 = arith.constant 0 : index
    %101 = arith.index_cast %c2_i32 : i32 to index
    %c0_18 = arith.constant 0 : index
    %102 = arith.index_cast %4 : i32 to index
    %103 = vector.load %arg5[%c0_17, %101, %c0_18, %102] : memref<1x4x4x128xf32, #tpu.memory_space<vmem>>, vector<1x1x4x128xf32>
    %104 = vector.shape_cast %103 : vector<1x1x4x128xf32> to vector<4x128xf32>
    %c0_19 = arith.constant 0 : index
    %105 = arith.index_cast %c2_i32 : i32 to index
    %c0_20 = arith.constant 0 : index
    %106 = arith.index_cast %4 : i32 to index
    %107 = vector.load %arg6[%c0_19, %105, %c0_20, %106] : memref<1x4x8x128xbf16, #tpu.memory_space<vmem>>, vector<1x1x8x128xbf16>
    %108 = vector.shape_cast %107 : vector<1x1x8x128xbf16> to vector<8x128xbf16>
    %109 = arith.extf %108 : vector<8x128xbf16> to vector<8x128xf32>
    %110 = vector.extract_strided_slice %104 {offsets = [0, 0], sizes = [2, 128], strides = [1, 1]} : vector<4x128xf32> to vector<2x128xf32>
    %111 = vector.extract_strided_slice %104 {offsets = [2, 0], sizes = [2, 128], strides = [1, 1]} : vector<4x128xf32> to vector<2x128xf32>
    %112 = vector.extract_strided_slice %109 {offsets = [0, 0], sizes = [4, 128], strides = [1, 1]} : vector<8x128xf32> to vector<4x128xf32>
    %113 = vector.extract_strided_slice %109 {offsets = [4, 0], sizes = [4, 128], strides = [1, 1]} : vector<8x128xf32> to vector<4x128xf32>
    %114 = vector.shape_cast %110 : vector<2x128xf32> to vector<2x1x128xf32>
    %115 = vector.shape_cast %114 : vector<2x1x128xf32> to vector<2x1x128xf32>
    %116 = vector.broadcast %115 : vector<2x1x128xf32> to vector<2x4x128xf32>
    %117 = vector.shape_cast %116 : vector<2x4x128xf32> to vector<8x128xf32>
    %118 = vector.shape_cast %111 : vector<2x128xf32> to vector<2x1x128xf32>
    %119 = vector.shape_cast %118 : vector<2x1x128xf32> to vector<2x1x128xf32>
    %120 = vector.broadcast %119 : vector<2x1x128xf32> to vector<2x4x128xf32>
    %121 = vector.shape_cast %120 : vector<2x4x128xf32> to vector<8x128xf32>
    %122 = vector.shape_cast %112 : vector<4x128xf32> to vector<1x4x128xf32>
    %123 = vector.shape_cast %122 : vector<1x4x128xf32> to vector<1x4x128xf32>
    %124 = vector.broadcast %123 : vector<1x4x128xf32> to vector<2x4x128xf32>
    %125 = vector.shape_cast %124 : vector<2x4x128xf32> to vector<8x128xf32>
    %126 = vector.shape_cast %113 : vector<4x128xf32> to vector<1x4x128xf32>
    %127 = vector.shape_cast %126 : vector<1x4x128xf32> to vector<1x4x128xf32>
    %128 = vector.broadcast %127 : vector<1x4x128xf32> to vector<2x4x128xf32>
    %129 = vector.shape_cast %128 : vector<2x4x128xf32> to vector<8x128xf32>
    %130 = arith.mulf %117, %125 : vector<8x128xf32>
    %131 = arith.addf %96, %130 : vector<8x128xf32>
    %132 = arith.mulf %121, %129 : vector<8x128xf32>
    %133 = arith.subf %131, %132 : vector<8x128xf32>
    %134 = arith.mulf %117, %129 : vector<8x128xf32>
    %135 = arith.addf %100, %134 : vector<8x128xf32>
    %136 = arith.mulf %121, %125 : vector<8x128xf32>
    %137 = arith.addf %135, %136 : vector<8x128xf32>
    %c3_i32 = arith.constant 3 : i32
    %c0_21 = arith.constant 0 : index
    %138 = arith.index_cast %c3_i32 : i32 to index
    %c0_22 = arith.constant 0 : index
    %139 = arith.index_cast %4 : i32 to index
    %140 = vector.load %arg5[%c0_21, %138, %c0_22, %139] : memref<1x4x4x128xf32, #tpu.memory_space<vmem>>, vector<1x1x4x128xf32>
    %141 = vector.shape_cast %140 : vector<1x1x4x128xf32> to vector<4x128xf32>
    %c0_23 = arith.constant 0 : index
    %142 = arith.index_cast %c3_i32 : i32 to index
    %c0_24 = arith.constant 0 : index
    %143 = arith.index_cast %4 : i32 to index
    %144 = vector.load %arg6[%c0_23, %142, %c0_24, %143] : memref<1x4x8x128xbf16, #tpu.memory_space<vmem>>, vector<1x1x8x128xbf16>
    %145 = vector.shape_cast %144 : vector<1x1x8x128xbf16> to vector<8x128xbf16>
    %146 = arith.extf %145 : vector<8x128xbf16> to vector<8x128xf32>
    %147 = vector.extract_strided_slice %141 {offsets = [0, 0], sizes = [2, 128], strides = [1, 1]} : vector<4x128xf32> to vector<2x128xf32>
    %148 = vector.extract_strided_slice %141 {offsets = [2, 0], sizes = [2, 128], strides = [1, 1]} : vector<4x128xf32> to vector<2x128xf32>
    %149 = vector.extract_strided_slice %146 {offsets = [0, 0], sizes = [4, 128], strides = [1, 1]} : vector<8x128xf32> to vector<4x128xf32>
    %150 = vector.extract_strided_slice %146 {offsets = [4, 0], sizes = [4, 128], strides = [1, 1]} : vector<8x128xf32> to vector<4x128xf32>
    %151 = vector.shape_cast %147 : vector<2x128xf32> to vector<2x1x128xf32>
    %152 = vector.shape_cast %151 : vector<2x1x128xf32> to vector<2x1x128xf32>
    %153 = vector.broadcast %152 : vector<2x1x128xf32> to vector<2x4x128xf32>
    %154 = vector.shape_cast %153 : vector<2x4x128xf32> to vector<8x128xf32>
    %155 = vector.shape_cast %148 : vector<2x128xf32> to vector<2x1x128xf32>
    %156 = vector.shape_cast %155 : vector<2x1x128xf32> to vector<2x1x128xf32>
    %157 = vector.broadcast %156 : vector<2x1x128xf32> to vector<2x4x128xf32>
    %158 = vector.shape_cast %157 : vector<2x4x128xf32> to vector<8x128xf32>
    %159 = vector.shape_cast %149 : vector<4x128xf32> to vector<1x4x128xf32>
    %160 = vector.shape_cast %159 : vector<1x4x128xf32> to vector<1x4x128xf32>
    %161 = vector.broadcast %160 : vector<1x4x128xf32> to vector<2x4x128xf32>
    %162 = vector.shape_cast %161 : vector<2x4x128xf32> to vector<8x128xf32>
    %163 = vector.shape_cast %150 : vector<4x128xf32> to vector<1x4x128xf32>
    %164 = vector.shape_cast %163 : vector<1x4x128xf32> to vector<1x4x128xf32>
    %165 = vector.broadcast %164 : vector<1x4x128xf32> to vector<2x4x128xf32>
    %166 = vector.shape_cast %165 : vector<2x4x128xf32> to vector<8x128xf32>
    %167 = arith.mulf %154, %162 : vector<8x128xf32>
    %168 = arith.addf %133, %167 : vector<8x128xf32>
    %169 = arith.mulf %158, %166 : vector<8x128xf32>
    %170 = arith.subf %168, %169 : vector<8x128xf32>
    %171 = arith.mulf %154, %166 : vector<8x128xf32>
    %172 = arith.addf %137, %171 : vector<8x128xf32>
    %173 = arith.mulf %158, %162 : vector<8x128xf32>
    %174 = arith.addf %172, %173 : vector<8x128xf32>
    %c4_i32 = arith.constant 4 : i32
    %175 = arith.mulf %170, %21 : vector<8x128xf32>
    %176 = arith.mulf %174, %25 : vector<8x128xf32>
    %177 = arith.subf %175, %176 : vector<8x128xf32>
    %c0_25 = arith.constant 0 : index
    %c0_26 = arith.constant 0 : index
    %c0_27 = arith.constant 0 : index
    %178 = arith.index_cast %4 : i32 to index
    %179 = vector.load %arg7[%c0_25, %c0_26, %c0_27, %178] : memref<1x2x8x128xf32, #tpu.memory_space<vmem>>, vector<1x1x8x128xf32>
    %180 = vector.shape_cast %179 : vector<1x1x8x128xf32> to vector<8x128xf32>
    %181 = vector.shape_cast %177 : vector<8x128xf32> to vector<1x1x8x128xf32>
    tpu.vector_store %arg7[%c0_25, %c0_26, %c0_27, %178], %181 {strides = array<i32>} : memref<1x2x8x128xf32, #tpu.memory_space<vmem>>, vector<1x1x8x128xf32>,
    %182 = arith.mulf %170, %25 : vector<8x128xf32>
    %183 = arith.mulf %174, %21 : vector<8x128xf32>
    %184 = arith.addf %182, %183 : vector<8x128xf32>
    %c0_28 = arith.constant 0 : index
    %c1 = arith.constant 1 : index
    %c0_29 = arith.constant 0 : index
    %185 = arith.index_cast %4 : i32 to index
    %186 = vector.load %arg7[%c0_28, %c1, %c0_29, %185] : memref<1x2x8x128xf32, #tpu.memory_space<vmem>>, vector<1x1x8x128xf32>
    %187 = vector.shape_cast %186 : vector<1x1x8x128xf32> to vector<8x128xf32>
    %188 = vector.shape_cast %184 : vector<8x128xf32> to vector<1x1x8x128xf32>
    tpu.vector_store %arg7[%c0_28, %c1, %c0_29, %185], %188 {strides = array<i32>} : memref<1x2x8x128xf32, #tpu.memory_space<vmem>>, vector<1x1x8x128xf32>,
    %c1_i32_30 = arith.constant 1 : i32
    return
  }
  func.func @transform_0(%arg0: i32, %arg1: i32) -> (i32, i32) {
    %c0_i32 = arith.constant 0 : i32
    %c0_i32_0 = arith.constant 0 : i32
    %c0_i32_1 = arith.constant 0 : i32
    return %c0_i32, %c0_i32_0 : i32, i32
  }
  func.func @transform_1(%arg0: i32, %arg1: i32) -> (i32, i32, i32) {
    %c0_i32 = arith.constant 0 : i32
    %c0_i32_0 = arith.constant 0 : i32
    return %arg0, %c0_i32, %arg1 : i32, i32, i32
  }
  func.func @transform_2(%arg0: i32, %arg1: i32) -> (i32, i32, i32) {
    %c0_i32 = arith.constant 0 : i32
    %c0_i32_0 = arith.constant 0 : i32
    return %arg0, %c0_i32, %arg1 : i32, i32, i32
  }
  func.func @transform_3(%arg0: i32, %arg1: i32) -> (i32, i32, i32, i32) {
    %c0_i32 = arith.constant 0 : i32
    %c0_i32_0 = arith.constant 0 : i32
    %c0_i32_1 = arith.constant 0 : i32
    return %arg0, %c0_i32, %c0_i32_0, %arg1 : i32, i32, i32, i32
  }
  func.func @transform_4(%arg0: i32, %arg1: i32) -> (i32, i32, i32, i32) {
    %c0_i32 = arith.constant 0 : i32
    %c0_i32_0 = arith.constant 0 : i32
    %c0_i32_1 = arith.constant 0 : i32
    return %arg0, %c0_i32, %c0_i32_0, %arg1 : i32, i32, i32, i32
  }
  func.func @transform_5(%arg0: i32, %arg1: i32) -> (i32, i32, i32, i32) {
    %c0_i32 = arith.constant 0 : i32
    %c0_i32_0 = arith.constant 0 : i32
    %c0_i32_1 = arith.constant 0 : i32
    return %arg0, %c0_i32, %c0_i32_0, %arg1 : i32, i32, i32, i32
  }
}

</mosaic_0001>

<bundles_post_ra>
// kernel: tpu_custom_call.1
= control target key start
LH: loop header
LB: loop body
LE: loop exit
PB: predicated region body
PF: predicated region fallthrough
CT: control target
= control target key end

     0   :  { %s1775_s0 = inlined_call_operand.hbm [shape: f32[2,8], index: 0, kind: input, shape index: {}]   ;;  %s1776_s1 = inlined_call_operand.hbm [shape: f32[2,8,256], index: 1, kind: input, shape index: {}]   ;;  %s1777_s2 = inlined_call_operand.hbm [shape: f32[2,1,256], index: 2, kind: input, shape index: {}]   ;;  %s1778_s3 = inlined_call_operand.hbm [shape: f32[2,4,4,128], index: 3, kind: input, shape index: {}]   ;;  %s1779_s4 = inlined_call_operand.hbm [shape: bf16[2,4,8,128], index: 4, kind: input, shape index: {}]   ;;  %s1780_s5 = inlined_call_operand.hbm [shape: f32[2,2,8,128], index: 5, kind: output, shape index: {}]  }
   0x1   :  { %1791 = sst [smem:[#allocation20_spill]] %s1776_s1 }
   0x2   :  { %1792 = sst [smem:[#allocation21_spill]] %s1778_s3 }
   0x3   :  { %10 = vsyncpa [#allocation3], 0 }
   0x4   :  { %11 = vsyncpa [#allocation6], 0 }
   0x5   :  { %13 = vsyncpa [#allocation6 + $0x1], 0 }
   0x6   :  { %14 = vsyncpa [#allocation9], 0 }
   0x7   :  { %16 = vsyncpa [#allocation9 + $0x1], 0 }
   0x8   :  { %17 = vsyncpa [#allocation4], 0 }
   0x9   :  { %19 = vsyncpa [#allocation4 + $0x1], 0  ;;  %s1458_s18 = smov 0   ;;  %s1460_s19 = smov 0  }
   0xa   :  { %s1462_s20 = smov 0   ;;  %s1464_s21 = smov 0  }
   0xb   :  { %s1466_s22 = smov 0   ;;  %s1468_s23 = smov 0  }
   0xc LB: > { %1793 = sst [smem:[#allocation16_spill]] %s1402_s20  ;;  %s37_s24 = sadd.s32 1, %s1410_s22  ;;  %s1414_s23 = sphi %s1468_s23, %s25_s23   ;;  %s1410_s22 = sphi %s1466_s22, %s1819_s22   ;;  %s1406_s21 = sphi %s1464_s21, %s1818_s21   ;;  %s1402_s20 = sphi %s1462_s20, %s1822_s20   ;;  %s1398_s19 = sphi %s1460_s19, %s1821_s19   ;;  %s1394_s18 = sphi %s1458_s18, %s1820_s18  }
   0xd   : > { %1794 = sst [smem:[#allocation17_spill]] %s1410_s22  ;;  %s67_s25 = sadd.s32 1, %s1402_s20 }
   0xe   : > { %p39_p0 = scmp.ge.s32.totalorder %s37_s24, 2  ;;  %p74_p1 = scmp.ne.s32.totalorder %s1402_s20, %s1398_s19 }
   0xf   : > { %p75_p2 = scmp.eq.s32.totalorder %s1414_s23, 0  ;;  %p1130_p5 = scmp.lt.s32.totalorder %s1414_s23, 2 }
  0x10   : > { %s1824_s24 = smov (%p39_p0, %s37_s24), 0  ;;  %s227_s27 = sand.u32 1, %s1414_s23  }
  0x11   : > { %1795 = sst [smem:[#allocation18_spill]] %s1824_s24  ;;  %p76_p4 = por %p75_p2, %p74_p1 }
  0x12   : > { %s62_s26 = ssub.s32 %s1410_s22, %s1824_s24  ;;  %s1781_s28 = sand.u32 1, %s1402_s20  }
  0x13   : > { %p65_p6 = scmp.eq.s32.totalorder %s62_s26, 0  ;;  %s1505_s29 = sshll.u32 %s1410_s22, 8 }
  0x14   : > { %s1053_s6 = sshll.u32 %s1781_s28, 4  ;;  %s1797_s1 = sld [smem:[#allocation20_spill]] }
  0x15   : > { %s1508_s30 = scalar_select %p65_p6, %s1402_s20, %s67_s25  }
  0x16   : > { %p1516_p7 = pnand %p1130_p5, %p76_p4  ;;  %s231_s11 = scalar_lea.vmem [#allocation5], %s1053_s6 }
  0x17   : > { %1796 = sst [smem:[#allocation19_spill]] %s1508_s30  ;;  %s241_s12 = sshll.u32 %s231_s11, 4  ;;  %s242_s12 = int_to_ptr.vmem [resolvable:$true] %s241_s12 }
  0x18   : > { %s1522_s13 = scalar_lea.sflag [#allocation6], %s227_s27  ;;  %p1789_p8 = pneg %p1516_p7 }
  0x19   : > { %s1201_s14 = scalar_lea.vmem %s242_s12, 256  ;;  %s1416_s15 = smov [#allocation5]  }
  0x1a   : > { %s239_s9 = scalar_lea.hbm %s1797_s1, %s1505_s29  ;;  %p1202_p9 = scmp.ne.s32.totalorder %s242_s12, %s1201_s14 }
  0x1b   : > { %s1206_s16 = sshll.u32 %s1416_s15, 4  ;;  %s1207_s16 = int_to_ptr.vmem [resolvable:$false] %s1206_s16 }
  0x1c   : > { %p1204_p10 = pnand %p1202_p9, %p1789_p8  ;;  %s1208_s17 = scalar_lea.vmem %s1207_s16, 512 }
  0x1d   : > { %p1209_p12 = scmp.lt.s32.totalorder %s242_s12, %s1207_s16  ;;  %p1210_p13 = scmp.lt.s32.totalorder %s1208_s17, %s1201_s14 }
  0x1e   : > { %p1205_p11 = pneg %p1204_p10 }
  0x1f   : > { %p1211_p0 = por %p1210_p13, %p1209_p12 }
  0x21   : > { %p1212_p2 = pnand %p1211_p0, %p1205_p11 }
  0x23   : > { %1215 = shalt.err (!%p1212_p2)
}
  0x24   : > { %1115 = dma.hbm_to_vmem [thread:$0]  (!%p1516_p7), %s239_s9, 256, %s242_s12, %s1522_s13  }
  0x25   : > { %s1799_s3 = sld [smem:[#allocation21_spill]]  ;;  %s295_s14 = scalar_lea.vmem [#allocation10], %s1053_s6 }
  0x26   : > { %s303_s16 = sshll.u32 %s295_s14, 4  ;;  %s273_s17 = scalar_lea.vmem [#allocation8], %s1053_s6  ;;  %s1540_s16 = int_to_ptr.vmem [resolvable:$true] %s303_s16 }
  0x27   : > { %s281_s28 = sshll.u32 %s273_s17, 4  ;;  %s1544_s1 = scalar_lea.sflag [#allocation9], %s227_s27  ;;  %s282_s28 = int_to_ptr.vmem [resolvable:$true] %s281_s28 }
  0x28   : > { %s1229_s24 = scalar_lea.vmem %s282_s28, 256  ;;  %s1417_s9 = smov [#allocation8]  }
  0x29   : > { %p1230_p4 = scmp.ne.s32.totalorder %s282_s28, %s1229_s24  ;;  %s1234_s12 = sshll.u32 %s1417_s9, 4  ;;  %s1235_s12 = int_to_ptr.vmem [resolvable:$false] %s1234_s12 }
  0x2a   : > { %s1236_s25 = scalar_lea.vmem %s1235_s12, 512  ;;  %p1237_p9 = scmp.lt.s32.totalorder %s282_s28, %s1235_s12 }
  0x2b   : > { %s280_s7 = scalar_lea.hbm %s1799_s3, %s1505_s29  ;;  %p1232_p5 = pnand %p1230_p4, %p1789_p8 }
  0x2c   : > { %p1238_p10 = scmp.lt.s32.totalorder %s1236_s25, %s1229_s24 }
  0x2d   : > { %p1233_p6 = pneg %p1232_p5 }
  0x2e   : > { %p1239_p11 = por %p1238_p10, %p1237_p9 }
  0x30   : > { %p1240_p12 = pnand %p1239_p11, %p1233_p6 }
  0x32   : > { %1243 = shalt.err (!%p1240_p12)
}
  0x33   : > { %s1783_s6 = smov 64   ;;  %s1784_s27 = smov 4  }
  0x34   : > { %1121 = dma.hbm_to_vmem [thread:$0]  (!%p1516_p7), %s280_s7, 256, %s282_s28, %s1544_s1, %s1783_s6, %s1783_s6, %s1784_s27  }
  0x35   : > { %s1556_s24 = sadd.s32 4294967295, %s1414_s23   ;;  %s1049_s26 = sadd.s32 4294967294, %s1414_s23  }
  0x36   : > { %p80_p13 = scmp.ne.s32.totalorder %s1398_s19, %s1394_s18  ;;  %p1788_p0 = scmp.eq.s32.totalorder %s1556_s24, 0 }
  0x37   : > { %p190_p2 = scmp.eq.s32.totalorder %s1556_s24, 1  ;;  %p196_p4 = scmp.eq.s32.totalorder %s1049_s26, 1 }
  0x38   : > { %p1565_p5 = por %p1788_p0, %p80_p13  ;;  %p1050_p6 = scmp.ge.s32.totalorder %s1414_s23, 1 }
  0x39   : > { %p1573_p9 = por %p190_p2, %p74_p1  ;;  %p1577_p10 = por %p196_p4, %p80_p13 }
  0x3a   : > { %s1800_s8 = scalar_select %p1565_p5, 1, 0 }
  0x3b   : > { %s1801_s28 = scalar_select %p1573_p9, 1, 0 }
  0x3c   : > { %s1802_s7 = scalar_select %p1577_p10, 1, 0 }
  0x3d   : > { %p203_p11 = scmp.lt.s32.totalorder %s1414_s23, 3  ;;  %s1803_s11 = sand.u32 1, %s1402_s20  }
  0x3e   : > { %s1056_s14 = sshll.u32 %s1803_s11, 1  ;;  %s1420_s9 = smov [#allocation2]  }
  0x3f   : > { %p1584_p12 = pnand %p1050_p6, %p203_p11  ;;  %s216_s12 = sshll.u32 %s1420_s9, 4  ;;  %s1588_s12 = int_to_ptr.vmem [resolvable:$true] %s216_s12 }
  0x40   : > { %s1090_s25 = sshll.u32 %s1410_s22, 5  ;;  %s252_s27 = scalar_lea.vmem [#allocation7], %s1056_s14 }
  0x41   : > { %p1108_p1 = pneg %p1584_p12  ;;  %s260_s6 = scalar_lea.hbm %s1777_s2, %s1090_s25 }
  0x42   : > { %s262_s3 = sshll.u32 %s252_s27, 4  ;;  %s1421_s9 = smov [#allocation7]   ;;  %s263_s3 = int_to_ptr.vmem [resolvable:$true] %s262_s3 }
  0x43   : > { %p1598_p13 = pnand %p1108_p1, %p1788_p0  ;;  %s1257_s30 = scalar_lea.vmem %s263_s3, 32 }
  0x44   : > { %p1258_p2 = scmp.ne.s32.totalorder %s263_s3, %s1257_s30  ;;  %s1262_s22 = sshll.u32 %s1421_s9, 4  ;;  %s1263_s22 = int_to_ptr.vmem [resolvable:$false] %s1262_s22 }
  0x45   : > { %s1264_s20 = scalar_lea.vmem %s1263_s22, 64  ;;  %p1265_p11 = scmp.lt.s32.totalorder %s263_s3, %s1263_s22 }
  0x46   : > { %p1260_p4 = pnand %p1258_p2, %p1789_p8  ;;  %p1266_p3 = scmp.lt.s32.totalorder %s1264_s20, %s1257_s30 }
  0x48   : > { %p1261_p6 = pneg %p1260_p4  ;;  %p1267_p10 = por %p1266_p3, %p1265_p11 }
  0x4a   : > { %p1268_p9 = pnand %p1267_p10, %p1261_p6 }
  0x4c   : > { %1271 = shalt.err (!%p1268_p9)
}
  0x4d   : > { %1118 = dma.hbm_to_vmem [thread:$0]  (!%p1516_p7), %s260_s6, 32, %s263_s3, %s1522_s13  }
  0x4e   : > { %p1274_p1 = pneg %p1598_p13  ;;  %s1283_s15 = scalar_lea.vmem %s1588_s12, 32 }
  0x4f   : > { %p1284_p2 = scmp.ne.s32.totalorder %s1588_s12, %s1283_s15  ;;  %p1291_p8 = scmp.lt.s32.totalorder %s1588_s12, %s1588_s12 }
  0x50   : > { %p1292_p5 = scmp.lt.s32.totalorder %s1283_s15, %s1283_s15 }
  0x51   : > { %p1286_p4 = pnand %p1284_p2, %p1274_p1 }
  0x52   : > { %p1293_p3 = por %p1292_p5, %p1291_p8 }
  0x53   : > { %p1287_p0 = pneg %p1286_p4 }
  0x55   : > { %p1294_p10 = pnand %p1293_p3, %p1287_p0 }
  0x57   : > { %1297 = shalt.err (!%p1294_p10)
}
  0x58   : > { %1111 = dma.hbm_to_vmem [thread:$0]  (!%p1598_p13), %s1775_s0, 32, %s1588_s12, [#allocation3]  }
  0x59   : > { %s1311_s3 = scalar_lea.vmem %s1540_s16, 256  ;;  %p1806_p6 = pneg %p1516_p7 }
  0x5a   : > { %p1312_p9 = scmp.ne.s32.totalorder %s1540_s16, %s1311_s3  ;;  %s1422_s30 = smov [#allocation10]  }
  0x5b   : > { %s1316_s13 = sshll.u32 %s1422_s30, 4  ;;  %s1317_s13 = int_to_ptr.vmem [resolvable:$false] %s1316_s13 }
  0x5c   : > { %p1314_p11 = pnand %p1312_p9, %p1806_p6  ;;  %s1318_s6 = scalar_lea.vmem %s1317_s13, 512 }
  0x5d   : > { %p1319_p8 = scmp.lt.s32.totalorder %s1540_s16, %s1317_s13  ;;  %p1320_p0 = scmp.lt.s32.totalorder %s1318_s6, %s1311_s3 }
  0x5e   : > { %p1315_p1 = pneg %p1314_p11 }
  0x5f   : > { %p1321_p5 = por %p1320_p0, %p1319_p8 }
  0x61   : > { %p1322_p2 = pnand %p1321_p5, %p1315_p1 }
  0x63   : > { %1325 = shalt.err (!%p1322_p2)
}
  0x64   : > { %s1807_s27 = smov 4   ;;  %s1808_s14 = smov 64  }
  0x65   : > { %s1809_s26 = scalar_lea.hbm %s1779_s4, %s1505_s29  ;;  %315 = sbr.rel (%p1584_p12) target bundleno = 343 (0x157), region = 40 }
  0x66   : > { %1124 = dma.hbm_to_vmem [thread:$0]  (!%p1516_p7), %s1809_s26, 256, %s1540_s16, %s1544_s1, %s1808_s14, %s1808_s14, %s1807_s27  }
  0x67   : > { %p1810_p13 = scmp.eq.s32.totalorder (!%p1584_p12), %s1556_s24, 0 }
  0x6a   : > { %1377 = dma.done.wait (%p1810_p13), [#allocation3], 32   ;;  %p1811_p4 = pmov %p1810_p13 }
  0x6b   : > { %s321_s10 = sand.u32 1, %s1556_s24   ;;  %s1646_s11 = sand.u32 1, %s1398_s19  }
  0x6c   : > { %1379 = vsyncadd (%p1811_p4), [#allocation3], 4294967264  ;;  %s1649_s9 = sshll.u32 %s1646_s11, 4  ;;  %s322_s1 = scalar_lea.sflag [#allocation6], %s321_s10 }
  0x6d   : > { %s325_s29 = scalar_lea.vmem [#allocation5], %s1649_s9  ;;  %p1812_p7 = scmp.ne.s32.totalorder %s1800_s8, 0 }
  0x6f   : > { %1381 = dma.done.wait (%p1812_p7), %s322_s1, 288  }
  0x70   : > { %1383 = vsyncadd (%p1812_p7), %s322_s1, 4294967008  ;;  %s1068_s16 = sshll.u32 %s1646_s11, 1  ;;  %s340_s24 = scalar_lea.sflag [#allocation9], %s321_s10 }
  0x71   : > { %s1657_s17 = scalar_lea.vmem [#allocation7], %s1068_s16  ;;  %s1660_s15 = scalar_lea.vmem [#allocation8], %s1649_s9 }
  0x72   : > { %1385 = dma.done.wait (%p1812_p7), %s340_s24, 512  }
  0x73   : > { %1387 = vsyncadd (%p1812_p7), %s340_s24, 4294966784  ;;  %v1423_v0 = vmov 0.0   ;;  %v398_v1 = vld [vmem:[%s325_s29 + $0x8] sm:$0xff]  ;;  %v397_v2 = vld [vmem:[%s325_s29] sm:$0xff]  ;;  %vm411_vm0 = vcmask 64512   ;;  %v401_v4 = vlaneseq  ;;  %s352_s8 = scalar_lea.vmem [#allocation10], %s1649_s9 }
  0x74   : > { %479 = vmatprep.mubr.f32.mxu0 %v1423_v0  ;;  %v396_v3 = vld [vmem:[#allocation2] sm:$0x3]  ;;  %445 = vmatprep.subr.mxu0 %v398_v1  ;;  %v1424_v5 = vmov 1966171168   ;;  %v553_v14 = vld [vmem:[%s352_s8] sm:$0xff]   ;;  %s1093_s20 = sshll.u32 %s1406_s21, 8 }
  0x75   : > { %446 = vmatpush1.msra.mxu0 %v397_v2  ;;  %v488_v6 = vunpack.c.l.s4 %v1424_v5  ;;  %v1666_v7 = vshrl.u32 %v401_v4, 7  ;;  %v1073_v9 = vld.sshfl [vmem:[%s1660_s15] sm:$0x33 pattern:$0x75316420]  ;;  %v554_v17 = vunpack.c.l.bf16 %v553_v14  ;;  %v626_v28 = vunpack.c.h.bf16 %v553_v14  ;;  %v1078_v46 = vld [vmem:[%s352_s8 + $0x8] sm:$0xff]   ;;  %s1725_s6 = scalar_lea.hbm %s1780_s5, %s1093_s20 }
  0x76   : > { %1072 = vmatmul.mubr.msk.f32.vlgmr.msra.gmra.mxu0 %vm411_vm0, %v396_v3  ;;  %v563_v11 = vcombine.high %v1073_v9, %v1073_v9  ;;  %v1076_v15 = vld.sshfl [vmem:[%s1660_s15 + $0x4] sm:$0x33 pattern:$0x75316420]  ;;  %v698_v55 = vunpack.c.l.bf16 %v1078_v46  ;;  %s393_s22 = scalar_lea.vmem [#allocation11], %s1649_s9  ;;  %s859_s21 = scalar_lea.sflag [#allocation4], %s1646_s11 }
  0x77   : > { %v489_v8 = vunpack.c.0.s8 %v488_v6  ;;  %v1679_v16 = vsub.s32 0, %v1666_v7  ;;  %v635_v20 = vcombine.high %v1076_v15, %v1076_v15  ;;  %v601_v25 = vcombine.high %v554_v17, %v554_v17  ;;  %v1079_v29 = vld.sshfl [vmem:[%s1660_s15 + $0x8] sm:$0x33 pattern:$0x75316420]  ;;  %s873_s3 = sshll.u32 %s393_s22, 4  ;;  %s1727_s3 = int_to_ptr.vmem [resolvable:$true] %s873_s3 }
  0x78   : > { %v707_v38 = vcombine.high %v1079_v29, %v1079_v29  ;;  %v673_v41 = vcombine.high %v626_v28, %v626_v28  ;;  %v1082_v58 = vld.sshfl [vmem:[%s1660_s15 + $0xc] sm:$0x33 pattern:$0x75316420]  ;;  %v745_v5 = vcombine.high %v698_v55, %v698_v55  ;;  %s1326_s27 = scalar_lea.vmem %s1727_s3, 256  ;;  %p1813_p3 = scmp.ne.s32.totalorder %s1801_s28, 0 }
  0x79   : > { %v1670_v10 = vsub.s32 %v489_v8, %v1666_v7  ;;  %v779_v6 = vcombine.high %v1082_v58, %v1082_v58  ;;  %p1327_p12 = scmp.ne.s32.totalorder %s1727_s3, %s1326_s27  ;;  %s1425_s14 = smov [#allocation11]  }
  0x7a   : > { %s1330_s12 = sshll.u32 %s1425_s14, 4  ;;  %s1331_s12 = int_to_ptr.vmem [resolvable:$false] %s1330_s12 }
  0x7b   : > { %v570_v12 = vrot.slane %v1073_v9, %v1670_v10  ;;  %v577_v13 = vrot.slane %v563_v11, %v1670_v10  ;;  %v642_v26 = vrot.slane %v1076_v15, %v1670_v10  ;;  %v649_v27 = vrot.slane %v635_v20, %v1670_v10  ;;  %p1328_p10 = pnand %p1327_p12, %p1813_p3  ;;  %s1332_s25 = scalar_lea.vmem %s1331_s12, 512 }
  0x7c   : > { %v714_v51 = vrot.slane %v1079_v29, %v1670_v10  ;;  %v721_v52 = vrot.slane %v707_v38, %v1670_v10  ;;  %p1333_p6 = scmp.lt.s32.totalorder %s1727_s3, %s1331_s12  ;;  %p1334_p11 = scmp.lt.s32.totalorder %s1332_s25, %s1326_s27 }
  0x7d   : > { %v588_v18 = vcombine.high %v570_v12, %v570_v12  ;;  %v589_v19 = vcombine.high %v577_v13, %v577_v13  ;;  %v581_v21 = vrot.slane %v570_v12, %v1679_v16  ;;  %v585_v22 = vrot.slane %v577_v13, %v1679_v16  ;;  %p1329_p9 = pneg %p1328_p10 }
  0x7e   : > { %v653_v34 = vrot.slane %v642_v26, %v1679_v16  ;;  %v657_v35 = vrot.slane %v649_v27, %v1679_v16  ;;  %v660_v36 = vcombine.high %v642_v26, %v642_v26  ;;  %v661_v37 = vcombine.high %v649_v27, %v649_v27  ;;  %v399_v27 = vld [vmem:[%s1657_s17] sm:$0x3]  ;;  %p1335_p1 = por %p1334_p11, %p1333_p6 }
  0x7f   : > { %v593_v23 = vrot.slane %v588_v18, %v1679_v16  ;;  %v597_v24 = vrot.slane %v589_v19, %v1679_v16  ;;  %v603_v30 = vmul.f32 %v581_v21, %v554_v17  ;;  %v604_v31 = vmul.f32 %v585_v22, %v554_v17 }
  0x80   : > { %v611_v39 = vmul.f32 %v601_v25, %v581_v21  ;;  %v612_v44 = vmul.f32 %v601_v25, %v585_v22  ;;  %v665_v47 = vrot.slane %v660_v36, %v1679_v16  ;;  %v669_v48 = vrot.slane %v661_v37, %v1679_v16  ;;  %p1336_p8 = pnand %p1335_p1, %p1329_p9 }
  0x81   : > { %v607_v32 = vmul.f32 %v601_v25, %v593_v23  ;;  %v608_v33 = vmul.f32 %v601_v25, %v597_v24  ;;  %v615_v40 = vmul.f32 %v593_v23, %v554_v17  ;;  %v616_v45 = vmul.f32 %v597_v24, %v554_v17 }
  0x82   : > { %v675_v49 = vmul.f32 %v653_v34, %v626_v28  ;;  %v676_v50 = vmul.f32 %v657_v35, %v626_v28  ;;  %v683_v54 = vmul.f32 %v673_v41, %v653_v34  ;;  %v684_v57 = vmul.f32 %v673_v41, %v657_v35 }
  0x83   : > { %v609_v42 = vsub.f32 %v603_v30, %v607_v32  ;;  %v610_v43 = vsub.f32 %v604_v31, %v608_v33  ;;  %v617_v53 = vadd.f32 %v615_v40, %v611_v39  ;;  %v618_v56 = vadd.f32 %v616_v45, %v612_v44 }
  0x84   : > { %v679_v61 = vmul.f32 %v673_v41, %v665_v47  ;;  %v680_v62 = vmul.f32 %v673_v41, %v669_v48  ;;  %v725_v63 = vrot.slane %v714_v51, %v1679_v16  ;;  %v729_v0 = vrot.slane %v721_v52, %v1679_v16 }
  0x85   : > { %v677_v59 = vadd.f32 %v675_v49, %v609_v42  ;;  %v678_v60 = vadd.f32 %v676_v50, %v610_v43  ;;  %v732_v1 = vcombine.high %v714_v51, %v714_v51  ;;  %v733_v2 = vcombine.high %v721_v52, %v721_v52 }
  0x86   : > { %v685_v3 = vadd.f32 %v683_v54, %v617_v53  ;;  %v687_v4 = vmul.f32 %v665_v47, %v626_v28  ;;  %v686_v8 = vadd.f32 %v684_v57, %v618_v56  ;;  %v688_v9 = vmul.f32 %v669_v48, %v626_v28 }
  0x87   : > { %v681_v11 = vsub.f32 %v677_v59, %v679_v61  ;;  %v682_v12 = vsub.f32 %v678_v60, %v680_v62  ;;  %v786_v13 = vrot.slane %v1082_v58, %v1670_v10  ;;  %v737_v14 = vrot.slane %v732_v1, %v1679_v16 }
  0x88   : > { %v741_v15 = vrot.slane %v733_v2, %v1679_v16  ;;  %v747_v17 = vmul.f32 %v725_v63, %v698_v55  ;;  %v748_v18 = vmul.f32 %v729_v0, %v698_v55  ;;  %v689_v19 = vadd.f32 %v687_v4, %v685_v3 }
  0x89   : > { %v755_v20 = vmul.f32 %v745_v5, %v725_v63  ;;  %v793_v21 = vrot.slane %v779_v6, %v1670_v10  ;;  %v690_v22 = vadd.f32 %v688_v9, %v686_v8  ;;  %v756_v23 = vmul.f32 %v745_v5, %v729_v0 }
  0x8a   : > { %v770_v24 = vunpack.c.h.bf16 %v1078_v46  ;;  %v797_v25 = vrot.slane %v786_v13, %v1679_v16  ;;  %v407_v26 = vsub.s32 1, %v1666_v7  ;;  %v749_v28 = vadd.f32 %v747_v17, %v681_v11 }
  0x8b   : > { %v750_v29 = vadd.f32 %v748_v18, %v682_v12  ;;  %v751_v30 = vmul.f32 %v745_v5, %v737_v14  ;;  %v752_v31 = vmul.f32 %v745_v5, %v741_v15  ;;  %v757_v32 = vadd.f32 %v755_v20, %v689_v19 }
  0x8c   : > { %v759_v33 = vmul.f32 %v737_v14, %v698_v55  ;;  %v801_v34 = vrot.slane %v793_v21, %v1679_v16  ;;  %v804_v35 = vcombine.high %v786_v13, %v786_v13  ;;  %v758_v36 = vadd.f32 %v756_v23, %v690_v22 }
  0x8d   : > { %v760_v37 = vmul.f32 %v741_v15, %v698_v55  ;;  %v805_v38 = vcombine.high %v793_v21, %v793_v21  ;;  %v817_v39 = vcombine.high %v770_v24, %v770_v24  ;;  %v404_v40 = vrot.slane %v399_v27, %v1679_v16 }
  0x8e   : > { %v753_v41 = vsub.f32 %v749_v28, %v751_v30  ;;  %v754_v42 = vsub.f32 %v750_v29, %v752_v31  ;;  %v819_v43 = vmul.f32 %v797_v25, %v770_v24  ;;  %v761_v7 = vadd.f32 %v759_v33, %v757_v32 }
  0x8f   : > { %v809_v44 = vrot.slane %v804_v35, %v1679_v16  ;;  %v820_v45 = vmul.f32 %v801_v34, %v770_v24  ;;  %v408_v46 = vrot.slane %v399_v27, %v407_v26  ;;  %v762_v48 = vadd.f32 %v760_v37, %v758_v36 }
  0x90   : > { %v813_v49 = vrot.slane %v805_v38, %v1679_v16  ;;  %v827_v50 = vmul.f32 %v817_v39, %v797_v25  ;;  %v828_v51 = vmul.f32 %v817_v39, %v801_v34  ;;  %v821_v53 = vadd.f32 %v819_v43, %v753_v41 }
  0x91   : > { %v822_v56 = vadd.f32 %v820_v45, %v754_v42  ;;  %v823_v57 = vmul.f32 %v817_v39, %v809_v44  ;;  %v831_v62 = vmul.f32 %v809_v44, %v770_v24 }
  0x92   : > { %v824_v59 = vmul.f32 %v817_v39, %v813_v49  ;;  %v829_v60 = vadd.f32 %v827_v50, %v761_v7  ;;  %v830_v61 = vadd.f32 %v828_v51, %v762_v48  ;;  %v832_v1 = vmul.f32 %v813_v49, %v770_v24 }
  0x93   : > { %v825_v8 = vsub.f32 %v821_v53, %v823_v57 }
  0x94   : > { %v833_v9 = vadd.f32 %v831_v62, %v829_v60  ;;  %v826_v12 = vsub.f32 %v822_v56, %v824_v59  ;;  %v834_v13 = vadd.f32 %v832_v1, %v830_v61 }
 0x136   : > { %v481_v47 = vpop.f32.mrf.mxu0 }
 0x137   : > { %v482_v52 = vadd.f32 %v481_v47, %v404_v40 }
 0x138   : > { %v483_v54 = vpop.f32.mrf.mxu0 }
 0x139   : > { %v493_v55 = vrot.slane %v482_v52, %v1670_v10  ;;  %v484_v58 = vadd.f32 %v483_v54, %v408_v46 }
 0x13b   : > { %v494_v63 = vcombine.high %v493_v55, %v493_v55  ;;  %v501_v0 = vrot.slane %v493_v55, %v1670_v10  ;;  %v526_v2 = vrot.slane %v484_v58, %v1670_v10 }
 0x13d   : > { %v508_v3 = vrot.slane %v494_v63, %v1670_v10  ;;  %v527_v4 = vcombine.high %v526_v2, %v526_v2  ;;  %v534_v5 = vrot.slane %v526_v2, %v1670_v10  ;;  %v512_v6 = vrot.slane %v501_v0, %v1679_v16 }
 0x13f   : > { %v516_v11 = vrot.slane %v508_v3, %v1679_v16  ;;  %v541_v14 = vrot.slane %v527_v4, %v1670_v10  ;;  %v545_v15 = vrot.slane %v534_v5, %v1679_v16  ;;  %v835_v18 = vmul.f32 %v825_v8, %v512_v6 }
 0x140   : > { %v848_v19 = vmul.f32 %v833_v9, %v512_v6 }
 0x141   : > { %v549_v17 = vrot.slane %v541_v14, %v1679_v16  ;;  %v837_v20 = vmul.f32 %v833_v9, %v545_v15  ;;  %v846_v21 = vmul.f32 %v825_v8, %v545_v15  ;;  %v836_v22 = vmul.f32 %v826_v12, %v516_v11 }
 0x142   : > { %v849_v23 = vmul.f32 %v834_v13, %v516_v11 }
 0x143   : > { %v838_v24 = vmul.f32 %v834_v13, %v549_v17  ;;  %v847_v25 = vmul.f32 %v826_v12, %v549_v17  ;;  %v839_v26 = vsub.f32 %v835_v18, %v837_v20  ;;  %v850_v10 = vadd.f32 %v848_v19, %v846_v21 }
 0x145   : > { %v840_v27 = vsub.f32 %v836_v22, %v838_v24  ;;  %v851_v28 = vadd.f32 %v849_v23, %v847_v25 }
 0x147   : > { %v843_v16 = vcombine.low %v839_v26, %v840_v27  ;;  %v854_v29 = vcombine.low %v850_v10, %v851_v28 }
 0x149   : > { %845 = vst [vmem:[%s393_s22] sm:$0xff] %v843_v16  ;;  %1083 = vst [vmem:[%s393_s22 + $0x8] sm:$0xff] %v854_v29 }
 0x14a   : > { %1339 = shalt.err (!%p1336_p8)
}
 0x14b   : > { %s1340_s26 = scalar_lea.hbm %s1725_s6, 256  ;;  %s1344_s1 = scalar_lea.hbm %s1780_s5, 512 }
 0x14c   : > { %p1341_p0 = scmp.ne.s32.totalorder %s1725_s6, %s1340_s26  ;;  %p1345_p13 = scmp.lt.s32.totalorder %s1725_s6, %s1780_s5 }
 0x14d   : > { %p1346_p4 = scmp.lt.s32.totalorder %s1344_s1, %s1340_s26 }
 0x14e   : > { %p1342_p5 = pnand %p1341_p0, %p1813_p3 }
 0x14f   : > { %p1347_p7 = por %p1346_p4, %p1345_p13 }
 0x150   : > { %p1343_p2 = pneg %p1342_p5 }
 0x152   : > { %p1348_p12 = pnand %p1347_p7, %p1343_p2 }
 0x154   : > { %1351 = shalt.err (!%p1348_p12)
}
 0x155   : > { %s1426_s17 = smov 128   ;;  %s1427_s24 = smov 8  }
 0x156   : > { %1106 = dma.vmem_to_hbm [thread:$0]  (%p1813_p3), %s1727_s3, 256, %s1725_s6, %s859_s21, %s1426_s17, %s1426_s17, %s1427_s24  }
 0x157 PF: > { %s888_s15 = sand.u32 1, %s1394_s18   ;;  %p1814_p10 = scmp.ne.s32.totalorder %s1802_s7, 0 }
 0x158   : > { %p1815_p9 = scmp.ge.s32.totalorder %s1414_s23, 2  ;;  %s889_s8 = scalar_lea.sflag [#allocation4], %s888_s15 }
 0x15a   : > { %p1126_p6 = pnand %p1815_p9, %p1814_p10 }
 0x15c   : > { %p1127_p11 = pneg %p1126_p6 }
 0x15e   : > { %1389 = dma.done.wait (%p1127_p11), %s889_s8, 256  }
 0x15f   : > { %1391 = vsyncadd (%p1127_p11), %s889_s8, 4294967040  ;;  %s25_s23 = sadd.s32 1, %s1414_s23   ;;  %s1816_s20 = sld [smem:[#allocation16_spill]] }
 0x160   : > { %p22_p1 = scmp.ge.s32.totalorder %s25_s23, 4   ;;  %s1817_s28 = sld [smem:[#allocation19_spill]] }
 0x161   : > { %s1818_s21 = sld [smem:[#allocation17_spill]]  ;;  %s1820_s18 = smov %s1398_s19 }
 0x162   : > { %s1819_s22 = sld [smem:[#allocation18_spill]]  ;;  %24 = sbr.rel (!%p22_p1) target bundleno = 12 (0xc), region = 132 }
 0x165   : > { %s1821_s19 = smov %s1816_s20 }
 0x166   : > { %s1822_s20 = smov %s1817_s28 }
 0x167   :  { %894 = vsyncpa [#allocation3], 1 }
 0x168   :  { %896 = vsyncpa [#allocation3 + $0x1], 1 }
 0x169   :  { %897 = vsyncpa [#allocation6], 1 }
 0x16a   :  { %899 = vsyncpa [#allocation6 + $0x1], 1 }
 0x16b   :  { %900 = vsyncpa [#allocation9], 1 }
 0x16c   :  { %902 = vsyncpa [#allocation9 + $0x1], 1 }
 0x16d   :  { %903 = vsyncpa [#allocation4], 1 }
 0x16e   :  { %905 = vsyncpa [#allocation4 + $0x1], 1 }

</bundles_post_ra>
